<compile_context>
chip_gen: v7x
topology: tpu7x:2x2x1
jax: 0.10.0
libtpu: 0.0.40
codegen_flags: <defaults>
</compile_context>

<pallas_src>
import math

import jax
import jax.numpy as jnp
from jax.experimental import pallas as pl
from jax.experimental.pallas import tpu as pltpu

NUM_BOND_TYPE = 6
NUM_BOND_DIRECTION = 3

# MXU-input dtype for weights / activations (accumulation is always fp32).
# bf16 hits native MXU rate and halves VMEM/HBM traffic; jnp.float32 recovers
# the module's exact LinearFp32 numerics at lower throughput.
MXU_DTYPE = jnp.bfloat16


def _round_up(a, b):
    return (a + b - 1) // b * b


# ---------------- kernel 1: h = PReLU(x) @ W_enc_to_dec^T (row-tiled) ----------------
def enc_to_dec_kernel(alpha_ref, x_ref, wed_ref, h_ref):
    x = x_ref[...]
    a = alpha_ref[0]                                  # scalar PReLU alpha from SMEM
    act = jnp.where(x > 0, x, a * x).astype(wed_ref.dtype)
    h_ref[...] = jnp.dot(act, wed_ref[...],
                         preferred_element_type=jnp.float32).astype(h_ref.dtype)


# ------- kernel 2: fused GINConv(aggr='add') + MLP (row tiles x source-node K tiles) -------
def gin_conv_kernel(adj_ref, h_ref, ce_ref, w1_ref, b1_ref, w2_ref, b2_ref,
                    out_ref, acc_ref):
    # gather -> message -> scatter fused into a count-adjacency matmul:
    #   agg = A @ h + (C @ E_cat),  A[v,u] = #edges u->v (incl. self loops).
    # C @ E_cat (lane-sparse K=16) is precomputed in the wrapper -> ce_ref,
    # used as the accumulator init.
    k = pl.program_id(1)

    @pl.when(k == 0)
    def _init():
        acc_ref[...] = ce_ref[...]                    # fp32 edge-embedding sums

    acc_ref[...] += jnp.dot(adj_ref[...], h_ref[...],
                            preferred_element_type=jnp.float32)

    @pl.when(k == pl.num_programs(1) - 1)
    def _finalize():
        # GIN MLP: Linear(H, 2H) -> ReLU -> Linear(2H, out), fp32 accumulation.
        agg = acc_ref[...].astype(w1_ref.dtype)
        hid = jnp.maximum(
            jnp.dot(agg, w1_ref[...], preferred_element_type=jnp.float32)
            + b1_ref[...], 0.0)
        out_ref[...] = (jnp.dot(hid.astype(w2_ref.dtype), w2_ref[...],
                                preferred_element_type=jnp.float32)
                        + b2_ref[...])


def init_params(key, hidden_dim, out_dim):
    ks = jax.random.split(key, 7)
    s = 0.1
    return dict(
        prelu_alpha=jnp.full((1, 1), 0.25, jnp.float32),
        wed_t=s * jax.random.normal(ks[0], (hidden_dim, hidden_dim), jnp.float32),
        edge_emb1=s * jax.random.normal(ks[1], (NUM_BOND_TYPE, hidden_dim), jnp.float32),
        edge_emb2=s * jax.random.normal(ks[2], (NUM_BOND_DIRECTION, hidden_dim), jnp.float32),
        w1_t=s * jax.random.normal(ks[3], (hidden_dim, 2 * hidden_dim), jnp.float32),
        b1=s * jax.random.normal(ks[4], (2 * hidden_dim,), jnp.float32),
        w2_t=s * jax.random.normal(ks[5], (2 * hidden_dim, out_dim), jnp.float32),
        b2=s * jax.random.normal(ks[6], (out_dim,), jnp.float32),
        # TODO(synk): dec_token is a module parameter but unused in forward().
    )


def gnn_decoder_forward(x, edge_index, edge_attr, params, *, row_tile=256, k_tile=512):
    N, H = x.shape
    H2 = params["w1_t"].shape[1]
    out_dim = params["w2_t"].shape[1]
    f32 = jnp.float32

    # --- tiling / lane-dense padding ---
    tm = min(row_tile, _round_up(N, 8))
    n_pad = _round_up(N, tm)
    if n_pad <= k_tile:
        tk = n_pad                                    # single contraction step
    else:
        tk = k_tile                                   # multiple of 128
        n_pad = _round_up(n_pad, (tm * tk) // math.gcd(tm, tk))
    h_pad = _round_up(H, 128)
    h2_pad = _round_up(H2, 128)
    o_pad = _round_up(out_dim, 128)
    n_tiles = n_pad // tm
    k_tiles = n_pad // tk

    # --- padded, lane-dense parameters; MXU operands stored narrow ---
    x_p = jnp.zeros((n_pad, h_pad), f32).at[:N, :H].set(x.astype(f32))
    wed_p = jnp.zeros((h_pad, h_pad), MXU_DTYPE).at[:H, :H].set(
        params["wed_t"].astype(MXU_DTYPE))
    w1_p = jnp.zeros((h_pad, h2_pad), MXU_DTYPE).at[:H, :H2].set(
        params["w1_t"].astype(MXU_DTYPE))
    b1_p = jnp.zeros((1, h2_pad), f32).at[:, :H2].set(params["b1"].reshape(1, -1))
    w2_p = jnp.zeros((h2_pad, o_pad), MXU_DTYPE).at[:H2, :out_dim].set(
        params["w2_t"].astype(MXU_DTYPE))
    b2_p = jnp.zeros((1, o_pad), f32).at[:, :out_dim].set(params["b2"].reshape(1, -1))

    # --- graph structure: self loops, gather/scatter fused into count matrices ---
    loop_idx = jnp.arange(N, dtype=edge_index.dtype)
    src = jnp.concatenate([edge_index[0], loop_idx])
    dst = jnp.concatenate([edge_index[1], loop_idx])
    ea0 = jnp.concatenate([edge_attr[:, 0], jnp.full((N,), 4, edge_attr.dtype)])
    ea1 = jnp.concatenate([edge_attr[:, 1], jnp.zeros((N,), edge_attr.dtype)])

    # A[v, u] = #edges u->v (incl. self loops), built directly in bf16
    # (exact for integer counts <= 256; molecular in-degrees are tiny).
    adj = jnp.zeros((n_pad, n_pad), jnp.bfloat16).at[dst, src].add(
        jnp.ones(src.shape, jnp.bfloat16))

    # Per-destination edge-embedding sums ce[v] = sum_in(Emb1[type] + Emb2[dir]),
    # precomputed via a tiny (N, 9) count matrix so the degenerate K=16 matmul
    # never reaches the kernel's MXU.
    ones_f = jnp.ones(src.shape, f32)
    cnt = jnp.zeros((n_pad, NUM_BOND_TYPE + NUM_BOND_DIRECTION), f32)
    cnt = cnt.at[dst, ea0].add(ones_f)
    cnt = cnt.at[dst, NUM_BOND_TYPE + ea1].add(ones_f)
    e_cat = jnp.concatenate([params["edge_emb1"], params["edge_emb2"]], axis=0)
    ce_p = jnp.zeros((n_pad, h_pad), f32).at[:, :H].set(cnt @ e_cat.astype(f32))

    alpha = params["prelu_alpha"].reshape((1,)).astype(f32)

    # --- VMEM budgeting / cost estimates ---
    bpe = 2 if MXU_DTYPE == jnp.bfloat16 else 4
    k1_vmem = 2 * tm * h_pad * 4 + 2 * h_pad * h_pad * bpe + 2 * tm * h_pad * bpe
    k2_vmem = (2 * tm * tk * 2 + 2 * tk * h_pad * bpe + 2 * tm * h_pad * 4
               + 2 * (h_pad * h2_pad * bpe + h2_pad * 4
                      + h2_pad * o_pad * bpe + o_pad * 4)
               + 2 * tm * o_pad * 4 + tm * h_pad * 4)
    vmem_limit = int(min(max(1.5 * max(k1_vmem, k2_vmem), 32 * 2**20), 64 * 2**20))

    k1_params = pltpu.CompilerParams(dimension_semantics=("parallel",),
                                     vmem_limit_bytes=vmem_limit)
    k2_params = pltpu.CompilerParams(dimension_semantics=("parallel", "arbitrary"),
                                     vmem_limit_bytes=vmem_limit)

    k1_cost = pl.CostEstimate(
        flops=2 * n_pad * h_pad * h_pad, transcendentals=0,
        bytes_accessed=(n_pad * h_pad * 4 + h_pad * h_pad * bpe + n_pad * h_pad * bpe))
    k2_cost = pl.CostEstimate(
        flops=2 * n_pad * (n_pad * h_pad + h_pad * h2_pad + h2_pad * o_pad),
        transcendentals=0,
        bytes_accessed=(n_pad * n_pad * 2 + n_tiles * n_pad * h_pad * bpe
                        + n_pad * h_pad * 4
                        + (h_pad * h2_pad + h2_pad * o_pad) * bpe
                        + (h2_pad + o_pad) * 4 + n_pad * o_pad * 4))

    def run(single_buffer):
        def resident(shape, index_map):
            # Constant-index blocks are fetched once; single-buffer them when the
            # installed Pallas supports pipeline_mode=Buffered(1).
            if single_buffer:
                return pl.BlockSpec(shape, index_map, pipeline_mode=pl.Buffered(1))
            return pl.BlockSpec(shape, index_map)

        # ---- kernel 1: row-tiled PReLU + enc_to_dec linear (h stored bf16) ----
        h_full = pl.pallas_call(
            enc_to_dec_kernel,
            grid=(n_tiles,),
            in_specs=[
                pl.BlockSpec(memory_space=pltpu.MemorySpace.SMEM),   # PReLU alpha
                pl.BlockSpec((tm, h_pad), lambda i: (i, 0)),         # x row tile
                resident((h_pad, h_pad), lambda i: (0, 0)),          # W_enc_to_dec^T
            ],
            out_specs=pl.BlockSpec((tm, h_pad), lambda i: (i, 0)),
            out_shape=jax.ShapeDtypeStruct((n_pad, h_pad), MXU_DTYPE),
            compiler_params=k1_params,
            cost_estimate=k1_cost,
        )(alpha, x_p, wed_p)

        # ---- kernel 2: K-tiled fused GIN aggregation + MLP ----
        out_p = pl.pallas_call(
            gin_conv_kernel,
            grid=(n_tiles, k_tiles),
            in_specs=[
                pl.BlockSpec((tm, tk), lambda i, k: (i, k)),         # adjacency tile (bf16)
                pl.BlockSpec((tk, h_pad), lambda i, k: (k, 0)),      # h source tile (bf16)
                pl.BlockSpec((tm, h_pad), lambda i, k: (i, 0)),      # edge-emb addend (f32)
                resident((h_pad, h2_pad), lambda i, k: (0, 0)),      # W1^T
                resident((1, h2_pad), lambda i, k: (0, 0)),          # b1
                resident((h2_pad, o_pad), lambda i, k: (0, 0)),      # W2^T
                resident((1, o_pad), lambda i, k: (0, 0)),           # b2
            ],
            out_specs=pl.BlockSpec((tm, o_pad), lambda i, k: (i, 0)),
            out_shape=jax.ShapeDtypeStruct((n_pad, o_pad), f32),
            scratch_shapes=[pltpu.VMEM((tm, h_pad), f32)],           # fp32 accumulator
            compiler_params=k2_params,
            cost_estimate=k2_cost,
        )(adj, h_full, ce_p, w1_p, b1_p, w2_p, b2_p)
        return jax.block_until_ready(out_p)

    if hasattr(pl, "Buffered"):
        try:
            out_p = run(True)
        except Exception:
            # pipeline_mode=Buffered(1) not accepted by this Pallas build:
            # fall back to default double-buffering (correctness identical).
            out_p = run(False)
    else:
        out_p = run(False)

    # Padded rows N..n_pad hold relu(b1)@W2 + b2 (not zeros) — always slice.
    return out_p[:N, :out_dim]


def gnn_decoder_reference(x, edge_index, edge_attr, params):
    """Pure-JAX fp32 reference mirroring the PyTorch forward."""
    N = x.shape[0]
    alpha = params["prelu_alpha"].reshape(())
    h = jnp.where(x > 0, x, alpha * x)
    h = h @ params["wed_t"]
    loop_idx = jnp.arange(N, dtype=edge_index.dtype)
    src = jnp.concatenate([edge_index[0], loop_idx])
    dst = jnp.concatenate([edge_index[1], loop_idx])
    ea0 = jnp.concatenate([edge_attr[:, 0], jnp.full((N,), 4, edge_attr.dtype)])
    ea1 = jnp.concatenate([edge_attr[:, 1], jnp.zeros((N,), edge_attr.dtype)])
    edge_emb = params["edge_emb1"][ea0] + params["edge_emb2"][ea1]
    msg = h[src] + edge_emb
    agg = jnp.zeros_like(h).at[dst].add(msg)
    hid = jnp.maximum(agg @ params["w1_t"] + params["b1"], 0.0)
    return hid @ params["w2_t"] + params["b2"]


if __name__ == "__main__":
    key = jax.random.PRNGKey(0)
    k_x, k_ei, k_ea0, k_ea1, k_p = jax.random.split(key, 5)

    N, H, OUT, E = 8, 32, 16, 12
    x = jax.random.normal(k_x, (N, H), jnp.float32)
    edge_index = jax.random.randint(k_ei, (2, E), 0, N, dtype=jnp.int32)
    edge_attr = jnp.stack(
        [jax.random.randint(k_ea0, (E,), 0, NUM_BOND_TYPE, dtype=jnp.int32),
         jax.random.randint(k_ea1, (E,), 0, NUM_BOND_DIRECTION, dtype=jnp.int32)],
        axis=1)

    params = init_params(k_p, H, OUT)

    out = gnn_decoder_forward(x, edge_index, edge_attr, params)
    out = jax.block_until_ready(out)

    ref = gnn_decoder_reference(x, edge_index, edge_attr, params)
    assert out.shape == (N, OUT)
    # bf16 MXU-input path (perf-review trade): ~1e-2 relative vs the fp32 reference.
    assert jnp.allclose(out, ref, rtol=2.5e-2, atol=2.5e-2), "mismatch vs pure-JAX reference"

    print("KERNEL_OK")
</pallas_src>

<mosaic_0001>
module attributes {stable_mosaic.version = 11 : i64} {
  func.func @enc_to_dec_kernel(%arg0: i32, %arg1: memref<1xf32, #tpu.memory_space<smem>>, %arg2: memref<8x128xf32, #tpu.memory_space<vmem>>, %arg3: memref<128x128xbf16, #tpu.memory_space<vmem>>, %arg4: memref<8x128xbf16, #tpu.memory_space<vmem>>) attributes {dimension_semantics = [#tpu.dimension_semantics<parallel>], iteration_bounds = array<i64: 1>, scalar_prefetch = 0 : i64, scratch_operands = 0 : i64, tpu.core_type = #tpu.core_type<tc>, window_params = [{transform_indices = @transform_0, window_bounds = array<i64: 1>}, {transform_indices = @transform_1, window_bounds = array<i64: 8, 128>}, {pipeline_mode = #tpu.pipeline_mode<synchronous>, transform_indices = @transform_2, window_bounds = array<i64: 128, 128>}, {transform_indices = @transform_3, window_bounds = array<i64: 8, 128>}]} {
    %c0 = arith.constant 0 : index
    %c0_0 = arith.constant 0 : index
    %0 = vector.load %arg2[%c0, %c0_0] : memref<8x128xf32, #tpu.memory_space<vmem>>, vector<8x128xf32>
    %c0_1 = arith.constant 0 : index
    %1 = memref.load %arg1[%c0_1] : memref<1xf32, #tpu.memory_space<smem>>
    %cst = arith.constant 0.000000e+00 : f32
    %2 = vector.broadcast %cst : f32 to vector<8x128xf32>
    %3 = arith.cmpf ogt, %0, %2 : vector<8x128xf32>
    %4 = vector.broadcast %1 : f32 to vector<8x128xf32>
    %5 = arith.mulf %4, %0 : vector<8x128xf32>
    %6 = arith.select %3, %0, %5 : vector<8x128xi1>, vector<8x128xf32>
    %7 = arith.truncf %6 : vector<8x128xf32> to vector<8x128xbf16>
    %c0_2 = arith.constant 0 : index
    %c0_3 = arith.constant 0 : index
    %8 = vector.load %arg3[%c0_2, %c0_3] : memref<128x128xbf16, #tpu.memory_space<vmem>>, vector<128x128xbf16>
    %cst_4 = arith.constant dense<0.000000e+00> : vector<8x128xf32>
    %9 = tpu.matmul %7, %8, %cst_4 {dimension_numbers = #tpu.dot_dimension_numbers<[1], [0], [0], [1], [0, 0, 1, 1], [], []>} : vector<8x128xbf16>, vector<128x128xbf16>, vector<8x128xf32> -> vector<8x128xf32>
    %10 = arith.truncf %9 : vector<8x128xf32> to vector<8x128xbf16>
    %c0_5 = arith.constant 0 : index
    %c0_6 = arith.constant 0 : index
    %11 = vector.load %arg4[%c0_5, %c0_6] : memref<8x128xbf16, #tpu.memory_space<vmem>>, vector<8x128xbf16>
    tpu.vector_store %arg4[%c0_5, %c0_6], %10 {strides = array<i32>} : memref<8x128xbf16, #tpu.memory_space<vmem>>, vector<8x128xbf16>,
    return
  }
  func.func @transform_0(%arg0: i32) -> i32 {
    %c0_i32 = arith.constant 0 : i32
    %c0_i32_0 = arith.constant 0 : i32
    return %c0_i32 : i32
  }
  func.func @transform_1(%arg0: i32) -> (i32, i32) {
    %c0_i32 = arith.constant 0 : i32
    %c0_i32_0 = arith.constant 0 : i32
    return %arg0, %c0_i32 : i32, i32
  }
  func.func @transform_2(%arg0: i32) -> (i32, i32) {
    %c0_i32 = arith.constant 0 : i32
    %c0_i32_0 = arith.constant 0 : i32
    %c0_i32_1 = arith.constant 0 : i32
    return %c0_i32, %c0_i32_0 : i32, i32
  }
  func.func @transform_3(%arg0: i32) -> (i32, i32) {
    %c0_i32 = arith.constant 0 : i32
    %c0_i32_0 = arith.constant 0 : i32
    return %arg0, %c0_i32 : i32, i32
  }
}

module attributes {stable_mosaic.version = 11 : i64} {
  func.func @enc_to_dec_kernel(%arg0: i32, %arg1: memref<1xf32, #tpu.memory_space<smem>>, %arg2: memref<8x128xf32, #tpu.memory_space<vmem>>, %arg3: memref<128x128xbf16, #tpu.memory_space<vmem>>, %arg4: memref<8x128xbf16, #tpu.memory_space<vmem>>) attributes {dimension_semantics = [#tpu.dimension_semantics<parallel>], iteration_bounds = array<i64: 1>, scalar_prefetch = 0 : i64, scratch_operands = 0 : i64, tpu.core_type = #tpu.core_type<tc>, window_params = [{transform_indices = @transform_0, window_bounds = array<i64: 1>}, {transform_indices = @transform_1, window_bounds = array<i64: 8, 128>}, {pipeline_mode = #tpu.pipeline_mode<synchronous>, transform_indices = @transform_2, window_bounds = array<i64: 128, 128>}, {transform_indices = @transform_3, window_bounds = array<i64: 8, 128>}]} {
    %c0 = arith.constant 0 : index
    %c0_0 = arith.constant 0 : index
    %0 = vector.load %arg2[%c0, %c0_0] : memref<8x128xf32, #tpu.memory_space<vmem>>, vector<8x128xf32>
    %c0_1 = arith.constant 0 : index
    %1 = memref.load %arg1[%c0_1] : memref<1xf32, #tpu.memory_space<smem>>
    %cst = arith.constant 0.000000e+00 : f32
    %2 = vector.broadcast %cst : f32 to vector<8x128xf32>
    %3 = arith.cmpf ogt, %0, %2 : vector<8x128xf32>
    %4 = vector.broadcast %1 : f32 to vector<8x128xf32>
    %5 = arith.mulf %4, %0 : vector<8x128xf32>
    %6 = arith.select %3, %0, %5 : vector<8x128xi1>, vector<8x128xf32>
    %7 = arith.truncf %6 : vector<8x128xf32> to vector<8x128xbf16>
    %c0_2 = arith.constant 0 : index
    %c0_3 = arith.constant 0 : index
    %8 = vector.load %arg3[%c0_2, %c0_3] : memref<128x128xbf16, #tpu.memory_space<vmem>>, vector<128x128xbf16>
    %cst_4 = arith.constant dense<0.000000e+00> : vector<8x128xf32>
    %9 = tpu.matmul %7, %8, %cst_4 {dimension_numbers = #tpu.dot_dimension_numbers<[1], [0], [0], [1], [0, 0, 1, 1], [], []>} : vector<8x128xbf16>, vector<128x128xbf16>, vector<8x128xf32> -> vector<8x128xf32>
    %10 = arith.truncf %9 : vector<8x128xf32> to vector<8x128xbf16>
    %c0_5 = arith.constant 0 : index
    %c0_6 = arith.constant 0 : index
    %11 = vector.load %arg4[%c0_5, %c0_6] : memref<8x128xbf16, #tpu.memory_space<vmem>>, vector<8x128xbf16>
    tpu.vector_store %arg4[%c0_5, %c0_6], %10 {strides = array<i32>} : memref<8x128xbf16, #tpu.memory_space<vmem>>, vector<8x128xbf16>,
    return
  }
  func.func @transform_0(%arg0: i32) -> i32 {
    %c0_i32 = arith.constant 0 : i32
    %c0_i32_0 = arith.constant 0 : i32
    return %c0_i32 : i32
  }
  func.func @transform_1(%arg0: i32) -> (i32, i32) {
    %c0_i32 = arith.constant 0 : i32
    %c0_i32_0 = arith.constant 0 : i32
    return %arg0, %c0_i32 : i32, i32
  }
  func.func @transform_2(%arg0: i32) -> (i32, i32) {
    %c0_i32 = arith.constant 0 : i32
    %c0_i32_0 = arith.constant 0 : i32
    %c0_i32_1 = arith.constant 0 : i32
    return %c0_i32, %c0_i32_0 : i32, i32
  }
  func.func @transform_3(%arg0: i32) -> (i32, i32) {
    %c0_i32 = arith.constant 0 : i32
    %c0_i32_0 = arith.constant 0 : i32
    return %arg0, %c0_i32 : i32, i32
  }
}

</mosaic_0001>

<bundles_post_ra>
// kernel: tpu_custom_call.1
= control target key start
LH: loop header
LB: loop body
LE: loop exit
PB: predicated region body
PF: predicated region fallthrough
CT: control target
= control target key end

     0   :  { %9 = vsyncpa [#allocation4], 0  ;;  %s369_s0 = inlined_call_operand.<no memory space> [shape: f32[1], index: 0, kind: input, shape index: {}]   ;;  %s370_s1 = inlined_call_operand.hbm [shape: f32[8,128], index: 1, kind: input, shape index: {}]   ;;  %s371_s2 = inlined_call_operand.hbm [shape: bf16[128,128], index: 2, kind: input, shape index: {}]   ;;  %s372_s3 = inlined_call_operand.hbm [shape: bf16[8,128], index: 3, kind: output, shape index: {}]  }
   0x1   :  { %10 = vsyncpa [#allocation7], 0 }
   0x2   :  { %11 = vsyncpa [#allocation5], 0  ;;  %s296_s12 = smov [#allocation3]   ;;  %s297_s14 = smov [#allocation6]  }
   0x3   :  { %s20_s13 = sshll.u32 %s296_s12, 4  ;;  %s29_s15 = sshll.u32 %s297_s14, 4  ;;  %s21_s13 = int_to_ptr.vmem [resolvable:$true] %s20_s13  ;;  %s323_s15 = int_to_ptr.vmem [resolvable:$true] %s29_s15 }
   0x4   :  { %s224_s18 = scalar_lea.hbm %s370_s1, 128 }
   0x5   :  { %p225_p0 = scmp.ne.s32.totalorder %s370_s1, %s224_s18  ;;  %p228_p1 = scmp.lt.u32.totalorder %s224_s18, %s370_s1 }
   0x7   :  { %p230_p2 = pnand %p228_p1, %p225_p0 }
   0x9   :  { %233 = shalt.err (!%p230_p2)
}
   0xa   :  { %s234_s23 = scalar_lea.vmem %s21_s13, 128  ;;  %p239_p4 = scmp.lt.s32.totalorder %s21_s13, %s21_s13 }
   0xb   :  { %p235_p3 = scmp.ne.s32.totalorder %s21_s13, %s234_s23  ;;  %p240_p5 = scmp.lt.s32.totalorder %s234_s23, %s234_s23 }
   0xd   :  { %p241_p6 = por %p240_p5, %p239_p4 }
   0xf   :  { %p242_p7 = pnand %p241_p6, %p235_p3 }
  0x11   :  { %245 = shalt.err (!%p242_p7)
}
  0x12   :  { %23 = dma.hbm_to_vmem [thread:$0]  %s370_s1, 128, %s21_s13, [#allocation4]  }
  0x13   :  { %s246_s28 = scalar_lea.hbm %s371_s2, 1024 }
  0x14   :  { %p247_p8 = scmp.ne.s32.totalorder %s371_s2, %s246_s28  ;;  %p250_p9 = scmp.lt.u32.totalorder %s246_s28, %s371_s2 }
  0x16   :  { %p252_p10 = pnand %p250_p9, %p247_p8 }
  0x18   :  { %255 = shalt.err (!%p252_p10)
}
  0x19   :  { %s256_s6 = scalar_lea.vmem %s323_s15, 1024  ;;  %p261_p12 = scmp.lt.s32.totalorder %s323_s15, %s323_s15 }
  0x1a   :  { %p257_p11 = scmp.ne.s32.totalorder %s323_s15, %s256_s6  ;;  %p262_p13 = scmp.lt.s32.totalorder %s256_s6, %s256_s6 }
  0x1c   :  { %p263_p0 = por %p262_p13, %p261_p12 }
  0x1e   :  { %p264_p1 = pnand %p263_p0, %p257_p11 }
  0x20   :  { %267 = shalt.err (!%p264_p1)
}
  0x21   :  { %s298_s1 = smov 64   ;;  %s299_s7 = smov 4  }
  0x22   :  { %35 = dma.hbm_to_vmem [thread:$0]  %s371_s2, 1024, %s323_s15, [#allocation7], %s298_s1, %s298_s1, %s299_s7  }
  0x23   :  { %290 = dma.done.wait [#allocation4], 128  }
  0x24   :  { %291 = vsyncadd [#allocation4], 4294967168 }
  0x25   :  { %292 = dma.done.wait [#allocation7], 1024  }
  0x26   :  { %293 = vsyncadd [#allocation7], 4294966272  ;;  %v300_v0 = vmov 0.0   ;;  %vm301_vm0 = vmmov 0   ;;  %v216_v1 = vld [vmem:[#allocation6] sm:$0xff]   ;;  %v217_v2 = vld [vmem:[#allocation6 + $0x8] sm:$0xff]   ;;  %v46_v8 = vstv %s369_s0 }
  0x27   :  { %189 = vmatprep.subr.bf16.mxu0 %v300_v0  ;;  %205 = vmatprep.mubr.msk.bf16.mxu0 %vm301_vm0, %v300_v0  ;;  %v218_v3 = vld [vmem:[#allocation6 + $0x10] sm:$0xff]   ;;  %v219_v4 = vld [vmem:[#allocation6 + $0x18] sm:$0xff]   ;;  %v220_v5 = vld [vmem:[#allocation6 + $0x20] sm:$0xff]   ;;  %s302_s11 = smov [#allocation8]  }
  0x28   :  { %190 = vmatpush3.bf16.msra.mxu0 %v216_v1  ;;  %v221_v6 = vld [vmem:[#allocation6 + $0x28] sm:$0xff]   ;;  %v43_v7 = vld [vmem:[#allocation3] sm:$0xff]  ;;  %v222_v9 = vld [vmem:[#allocation6 + $0x30] sm:$0xff]   ;;  %s162_s12 = sshll.u32 %s302_s11, 4  ;;  %s163_s12 = int_to_ptr.vmem [resolvable:$true] %s162_s12 }
  0x29   :  { %191 = vmatprep.subr.bf16.mxu0 %v300_v0  ;;  %v47_v10 = vmul.f32 %v46_v8, %v43_v7  ;;  %vm45_vm1 = vcmp.gt.f32.partialorder %v43_v7, 0.0  ;;  %v223_v11 = vld [vmem:[#allocation6 + $0x38] sm:$0xff]   ;;  %s268_s0 = scalar_lea.vmem %s163_s12, 64  ;;  %p273_p3 = scmp.lt.s32.totalorder %s163_s12, %s163_s12 }
  0x2a   :  { %p269_p2 = scmp.ne.s32.totalorder %s163_s12, %s268_s0  ;;  %p274_p4 = scmp.lt.s32.totalorder %s268_s0, %s268_s0 }
  0x2b   :  { %v48_v12 = vsel %vm45_vm1, %v43_v7, %v47_v10 }
  0x2c   :  { %192 = vmatpush3.bf16.msra.mxu0 %v217_v2  ;;  %v49_v13 = vpack.c.bf16 %v48_v12, %v48_v12  ;;  %p275_p5 = por %p274_p4, %p273_p3 }
  0x2d   :  { %193 = vmatprep.subr.bf16.mxu0 %v300_v0 }
  0x2e   :  { %p276_p6 = pnand %p275_p5, %p269_p2 }
  0x30   :  { %194 = vmatpush3.bf16.msra.mxu0 %v218_v3 }
  0x31   :  { %195 = vmatprep.subr.bf16.mxu0 %v300_v0 }
  0x34   :  { %196 = vmatpush3.bf16.msra.mxu0 %v219_v4 }
  0x35   :  { %197 = vmatprep.subr.bf16.mxu0 %v300_v0 }
  0x38   :  { %198 = vmatpush3.bf16.msra.mxu0 %v220_v5 }
  0x39   :  { %199 = vmatprep.subr.bf16.mxu0 %v300_v0 }
  0x3c   :  { %200 = vmatpush3.bf16.msra.mxu0 %v221_v6 }
  0x3d   :  { %201 = vmatprep.subr.bf16.mxu0 %v300_v0 }
  0x40   :  { %202 = vmatpush3.bf16.msra.mxu0 %v222_v9 }
  0x41   :  { %203 = vmatprep.subr.bf16.mxu0 %v300_v0 }
  0x44   :  { %204 = vmatpush3.bf16.msra.mxu0 %v223_v11 }
  0x47   :  { %206 = vmatmul.mubr.bf16.vlgmr.msra.gmra.mrb[0].mxu0 %v49_v13 }
 0x11a   :  { %v148_v14 = vpop.f32.mrb[0].mxu0 }
 0x11b   :  { %v154_v15 = vpack.c.bf16 %v148_v14, %v148_v14  ;;  %v207_v16 = vpop.f32.mrb[1].mxu0 }
 0x11c   :  { %v151_v17 = vpop.f32.mrb[2].mxu0 }
 0x11d   :  { %155 = vst [vmem:[#allocation8] sm:$0xf] %v154_v15  ;;  %v208_v18 = vpop.f32.mrb[3].mxu0 }
 0x11e   :  { %279 = shalt.err (!%p276_p6)
}
 0x11f   :  { %s280_s15 = scalar_lea.hbm %s372_s3, 64 }
 0x120   :  { %p281_p7 = scmp.ne.s32.totalorder %s372_s3, %s280_s15  ;;  %p284_p8 = scmp.lt.u32.totalorder %s280_s15, %s372_s3 }
 0x122   :  { %p286_p9 = pnand %p284_p8, %p281_p7 }
 0x124   :  { %289 = shalt.err (!%p286_p9)
}
 0x125   :  { %165 = dma.vmem_to_hbm [thread:$0]  %s163_s12, 64, %s372_s3, [#allocation5]  }
 0x126   :  { %294 = dma.done.wait [#allocation5], 64  }
 0x127   :  { %295 = vsyncadd [#allocation5], 4294967232 }
 0x128   :  { %169 = vsyncpa [#allocation4], 1 }
 0x129   :  { %170 = vsyncpa [#allocation7], 1 }
 0x12a   :  { %171 = vsyncpa [#allocation5], 1 }

// kernel: tpu_custom_call.1
= control target key start
LH: loop header
LB: loop body
LE: loop exit
PB: predicated region body
PF: predicated region fallthrough
CT: control target
= control target key end

     0   :  { %9 = vsyncpa [#allocation4], 0  ;;  %s369_s0 = inlined_call_operand.<no memory space> [shape: f32[1], index: 0, kind: input, shape index: {}]   ;;  %s370_s1 = inlined_call_operand.hbm [shape: f32[8,128], index: 1, kind: input, shape index: {}]   ;;  %s371_s2 = inlined_call_operand.hbm [shape: bf16[128,128], index: 2, kind: input, shape index: {}]   ;;  %s372_s3 = inlined_call_operand.hbm [shape: bf16[8,128], index: 3, kind: output, shape index: {}]  }
   0x1   :  { %10 = vsyncpa [#allocation7], 0 }
   0x2   :  { %11 = vsyncpa [#allocation5], 0  ;;  %s296_s12 = smov [#allocation3]   ;;  %s297_s14 = smov [#allocation6]  }
   0x3   :  { %s20_s13 = sshll.u32 %s296_s12, 4  ;;  %s29_s15 = sshll.u32 %s297_s14, 4  ;;  %s21_s13 = int_to_ptr.vmem [resolvable:$true] %s20_s13  ;;  %s323_s15 = int_to_ptr.vmem [resolvable:$true] %s29_s15 }
   0x4   :  { %s224_s18 = scalar_lea.hbm %s370_s1, 128 }
   0x5   :  { %p225_p0 = scmp.ne.s32.totalorder %s370_s1, %s224_s18  ;;  %p228_p1 = scmp.lt.u32.totalorder %s224_s18, %s370_s1 }
   0x7   :  { %p230_p2 = pnand %p228_p1, %p225_p0 }
   0x9   :  { %233 = shalt.err (!%p230_p2)
}
   0xa   :  { %s234_s23 = scalar_lea.vmem %s21_s13, 128  ;;  %p239_p4 = scmp.lt.s32.totalorder %s21_s13, %s21_s13 }
   0xb   :  { %p235_p3 = scmp.ne.s32.totalorder %s21_s13, %s234_s23  ;;  %p240_p5 = scmp.lt.s32.totalorder %s234_s23, %s234_s23 }
   0xd   :  { %p241_p6 = por %p240_p5, %p239_p4 }
   0xf   :  { %p242_p7 = pnand %p241_p6, %p235_p3 }
  0x11   :  { %245 = shalt.err (!%p242_p7)
}
  0x12   :  { %23 = dma.hbm_to_vmem [thread:$0]  %s370_s1, 128, %s21_s13, [#allocation4]  }
  0x13   :  { %s246_s28 = scalar_lea.hbm %s371_s2, 1024 }
  0x14   :  { %p247_p8 = scmp.ne.s32.totalorder %s371_s2, %s246_s28  ;;  %p250_p9 = scmp.lt.u32.totalorder %s246_s28, %s371_s2 }
  0x16   :  { %p252_p10 = pnand %p250_p9, %p247_p8 }
  0x18   :  { %255 = shalt.err (!%p252_p10)
}
  0x19   :  { %s256_s6 = scalar_lea.vmem %s323_s15, 1024  ;;  %p261_p12 = scmp.lt.s32.totalorder %s323_s15, %s323_s15 }
  0x1a   :  { %p257_p11 = scmp.ne.s32.totalorder %s323_s15, %s256_s6  ;;  %p262_p13 = scmp.lt.s32.totalorder %s256_s6, %s256_s6 }
  0x1c   :  { %p263_p0 = por %p262_p13, %p261_p12 }
  0x1e   :  { %p264_p1 = pnand %p263_p0, %p257_p11 }
  0x20   :  { %267 = shalt.err (!%p264_p1)
}
  0x21   :  { %s298_s1 = smov 64   ;;  %s299_s7 = smov 4  }
  0x22   :  { %35 = dma.hbm_to_vmem [thread:$0]  %s371_s2, 1024, %s323_s15, [#allocation7], %s298_s1, %s298_s1, %s299_s7  }
  0x23   :  { %290 = dma.done.wait [#allocation4], 128  }
  0x24   :  { %291 = vsyncadd [#allocation4], 4294967168 }
  0x25   :  { %292 = dma.done.wait [#allocation7], 1024  }
  0x26   :  { %293 = vsyncadd [#allocation7], 4294966272  ;;  %v300_v0 = vmov 0.0   ;;  %vm301_vm0 = vmmov 0   ;;  %v216_v1 = vld [vmem:[#allocation6] sm:$0xff]   ;;  %v217_v2 = vld [vmem:[#allocation6 + $0x8] sm:$0xff]   ;;  %v46_v8 = vstv %s369_s0 }
  0x27   :  { %189 = vmatprep.subr.bf16.mxu0 %v300_v0  ;;  %205 = vmatprep.mubr.msk.bf16.mxu0 %vm301_vm0, %v300_v0  ;;  %v218_v3 = vld [vmem:[#allocation6 + $0x10] sm:$0xff]   ;;  %v219_v4 = vld [vmem:[#allocation6 + $0x18] sm:$0xff]   ;;  %v220_v5 = vld [vmem:[#allocation6 + $0x20] sm:$0xff]   ;;  %s302_s11 = smov [#allocation8]  }
  0x28   :  { %190 = vmatpush3.bf16.msra.mxu0 %v216_v1  ;;  %v221_v6 = vld [vmem:[#allocation6 + $0x28] sm:$0xff]   ;;  %v43_v7 = vld [vmem:[#allocation3] sm:$0xff]  ;;  %v222_v9 = vld [vmem:[#allocation6 + $0x30] sm:$0xff]   ;;  %s162_s12 = sshll.u32 %s302_s11, 4  ;;  %s163_s12 = int_to_ptr.vmem [resolvable:$true] %s162_s12 }
  0x29   :  { %191 = vmatprep.subr.bf16.mxu0 %v300_v0  ;;  %v47_v10 = vmul.f32 %v46_v8, %v43_v7  ;;  %vm45_vm1 = vcmp.gt.f32.partialorder %v43_v7, 0.0  ;;  %v223_v11 = vld [vmem:[#allocation6 + $0x38] sm:$0xff]   ;;  %s268_s0 = scalar_lea.vmem %s163_s12, 64  ;;  %p273_p3 = scmp.lt.s32.totalorder %s163_s12, %s163_s12 }
  0x2a   :  { %p269_p2 = scmp.ne.s32.totalorder %s163_s12, %s268_s0  ;;  %p274_p4 = scmp.lt.s32.totalorder %s268_s0, %s268_s0 }
  0x2b   :  { %v48_v12 = vsel %vm45_vm1, %v43_v7, %v47_v10 }
  0x2c   :  { %192 = vmatpush3.bf16.msra.mxu0 %v217_v2  ;;  %v49_v13 = vpack.c.bf16 %v48_v12, %v48_v12  ;;  %p275_p5 = por %p274_p4, %p273_p3 }
  0x2d   :  { %193 = vmatprep.subr.bf16.mxu0 %v300_v0 }
  0x2e   :  { %p276_p6 = pnand %p275_p5, %p269_p2 }
  0x30   :  { %194 = vmatpush3.bf16.msra.mxu0 %v218_v3 }
  0x31   :  { %195 = vmatprep.subr.bf16.mxu0 %v300_v0 }
  0x34   :  { %196 = vmatpush3.bf16.msra.mxu0 %v219_v4 }
  0x35   :  { %197 = vmatprep.subr.bf16.mxu0 %v300_v0 }
  0x38   :  { %198 = vmatpush3.bf16.msra.mxu0 %v220_v5 }
  0x39   :  { %199 = vmatprep.subr.bf16.mxu0 %v300_v0 }
  0x3c   :  { %200 = vmatpush3.bf16.msra.mxu0 %v221_v6 }
  0x3d   :  { %201 = vmatprep.subr.bf16.mxu0 %v300_v0 }
  0x40   :  { %202 = vmatpush3.bf16.msra.mxu0 %v222_v9 }
  0x41   :  { %203 = vmatprep.subr.bf16.mxu0 %v300_v0 }
  0x44   :  { %204 = vmatpush3.bf16.msra.mxu0 %v223_v11 }
  0x47   :  { %206 = vmatmul.mubr.bf16.vlgmr.msra.gmra.mrb[0].mxu0 %v49_v13 }
 0x11a   :  { %v148_v14 = vpop.f32.mrb[0].mxu0 }
 0x11b   :  { %v154_v15 = vpack.c.bf16 %v148_v14, %v148_v14  ;;  %v207_v16 = vpop.f32.mrb[1].mxu0 }
 0x11c   :  { %v151_v17 = vpop.f32.mrb[2].mxu0 }
 0x11d   :  { %155 = vst [vmem:[#allocation8] sm:$0xf] %v154_v15  ;;  %v208_v18 = vpop.f32.mrb[3].mxu0 }
 0x11e   :  { %279 = shalt.err (!%p276_p6)
}
 0x11f   :  { %s280_s15 = scalar_lea.hbm %s372_s3, 64 }
 0x120   :  { %p281_p7 = scmp.ne.s32.totalorder %s372_s3, %s280_s15  ;;  %p284_p8 = scmp.lt.u32.totalorder %s280_s15, %s372_s3 }
 0x122   :  { %p286_p9 = pnand %p284_p8, %p281_p7 }
 0x124   :  { %289 = shalt.err (!%p286_p9)
}
 0x125   :  { %165 = dma.vmem_to_hbm [thread:$0]  %s163_s12, 64, %s372_s3, [#allocation5]  }
 0x126   :  { %294 = dma.done.wait [#allocation5], 64  }
 0x127   :  { %295 = vsyncadd [#allocation5], 4294967232 }
 0x128   :  { %169 = vsyncpa [#allocation4], 1 }
 0x129   :  { %170 = vsyncpa [#allocation7], 1 }
 0x12a   :  { %171 = vsyncpa [#allocation5], 1 }

</bundles_post_ra>
